<compile_context>
chip_gen: v6e
topology: v6e:2x2x1
jax: 0.10.0
libtpu: 0.0.40
codegen_flags: <defaults>
</compile_context>

<pallas_src>
import jax
import jax.numpy as jnp
from jax.experimental import pallas as pl
from jax.experimental.pallas import tpu as pltpu


def _round_up(x, m):
    return ((x + m - 1) // m) * m


def _vmem_limit_bytes():
    # ~3/4 of physical VMEM per TensorCore: ~48 MiB on v7x (64 MiB phys),
    # ~96 MiB on v5e / v6e (128 MiB phys). Safe fallback if the query fails.
    try:
        cap = int(pltpu.get_tpu_info().vmem_capacity_bytes)
    except Exception:
        cap = 64 * 1024 * 1024
    return int(max(32 * 1024 * 1024, min((cap * 3) // 4, 96 * 1024 * 1024)))


# ---------------------------------------------------------------------------
# Kernel 1: per-layer feature transform  H = X @ [W_l | W_r] + [0 | b]
#   x_ref : (tm, h_in)        bf16   node-row tile of previous activations
#   w_ref : (h_in, 2*H)       bf16   [W_l | W_r]   (grid-invariant)
#   b_ref : (1, 2*H)          f32    [0 | b]       (grid-invariant)
#   o_ref : (tm, 2*H)         bf16
# ---------------------------------------------------------------------------
def transform_kernel(x_ref, w_ref, b_ref, o_ref):
    o_ref[...] = (
        jnp.dot(x_ref[...], w_ref[...], preferred_element_type=jnp.float32)
        + b_ref[...]
    ).astype(o_ref.dtype)


def _transform(x, w, b, tm, vmem_limit):
    n_pad, h_in = x.shape
    h2 = w.shape[1]
    cost = pl.CostEstimate(
        flops=2 * n_pad * h_in * h2,
        transcendentals=0,
        bytes_accessed=x.size * 2 + w.size * 2 + b.size * 4 + n_pad * h2 * 2,
    )
    return pl.pallas_call(
        transform_kernel,
        out_shape=jax.ShapeDtypeStruct((n_pad, h2), jnp.bfloat16),
        grid_spec=pltpu.PrefetchScalarGridSpec(
            num_scalar_prefetch=0,
            grid=(n_pad // tm,),
            in_specs=[
                pl.BlockSpec((tm, h_in), lambda i: (i, 0)),
                pl.BlockSpec((h_in, h2), lambda i: (0, 0)),  # fetched once (const idx)
                pl.BlockSpec((1, h2), lambda i: (0, 0)),
            ],
            out_specs=pl.BlockSpec((tm, h2), lambda i: (i, 0)),
        ),
        compiler_params=pltpu.CompilerParams(
            dimension_semantics=("parallel",),
            vmem_limit_bytes=vmem_limit,
        ),
        cost_estimate=cost,
    )(x, w, b)


# ---------------------------------------------------------------------------
# Kernel 2: neighbor aggregation  out = (A @ H_l) * inv_deg + H_r
#   grid = (node-row tiles, K tiles over source nodes)
#   a_ref  : (tm, tk)   bf16  0/1 adjacency tile
#   hl_ref : (tk, H)    bf16  neighbor-transformed features (X @ W_l)
#   hr_ref : (tm, H)    bf16  root-transformed features + bias (X @ W_r + b)
#   inv_ref: (tm, 1)    f32   1 / max(deg, 1)
#   o_ref  : (tm, H)    bf16
#   acc_ref: (tm, H)    f32   VMEM scratch accumulator
# ---------------------------------------------------------------------------
def aggregate_kernel(a_ref, hl_ref, hr_ref, inv_ref, o_ref, acc_ref):
    k = pl.program_id(1)

    @pl.when(k == 0)
    def _():
        acc_ref[...] = jnp.zeros_like(acc_ref)

    acc_ref[...] += jnp.dot(a_ref[...], hl_ref[...],
                            preferred_element_type=jnp.float32)

    @pl.when(k == pl.num_programs(1) - 1)
    def _():
        o_ref[...] = (
            acc_ref[...] * inv_ref[...] + hr_ref[...].astype(jnp.float32)
        ).astype(o_ref.dtype)


def _aggregate(adj, h2, inv_deg, h_pad, tm, tk, vmem_limit):
    n_pad = adj.shape[0]
    cost = pl.CostEstimate(
        flops=2 * n_pad * n_pad * h_pad,
        transcendentals=0,
        bytes_accessed=adj.size * 2 + h2.size * 2 + inv_deg.size * 4
        + n_pad * h_pad * 2,
    )
    return pl.pallas_call(
        aggregate_kernel,
        out_shape=jax.ShapeDtypeStruct((n_pad, h_pad), jnp.bfloat16),
        grid_spec=pltpu.PrefetchScalarGridSpec(
            num_scalar_prefetch=0,
            grid=(n_pad // tm, n_pad // tk),
            in_specs=[
                pl.BlockSpec((tm, tk), lambda i, k: (i, k)),       # A tile
                pl.BlockSpec((tk, h_pad), lambda i, k: (k, 0)),    # H[:, :H]
                pl.BlockSpec((tm, h_pad), lambda i, k: (i, 1)),    # H[:, H:]
                pl.BlockSpec((tm, 1), lambda i, k: (i, 0)),        # 1/deg
            ],
            out_specs=pl.BlockSpec((tm, h_pad), lambda i, k: (i, 0)),
            scratch_shapes=[pltpu.VMEM((tm, h_pad), jnp.float32)],
        ),
        compiler_params=pltpu.CompilerParams(
            dimension_semantics=("parallel", "arbitrary"),
            vmem_limit_bytes=vmem_limit,
        ),
        cost_estimate=cost,
    )(adj, h2, h2, inv_deg)


# ---------------------------------------------------------------------------
# Kernel 3: masked BatchNorm statistics (E[x], E[x^2]) — row-tiled reduction.
#   x_ref    : (te, H)  bf16
#   w_ref    : (te, 1)  f32   row-validity mask pre-scaled by 1/n_nodes
#   stats_ref: (2, H)   f32   row 0 = E[x], row 1 = E[x^2]   (accumulator)
# ---------------------------------------------------------------------------
def bn_stats_kernel(x_ref, w_ref, stats_ref):
    @pl.when(pl.program_id(0) == 0)
    def _():
        stats_ref[...] = jnp.zeros_like(stats_ref)

    x = x_ref[...].astype(jnp.float32)
    xw = x * w_ref[...]
    s1 = jnp.sum(xw, axis=0, keepdims=True)
    s2 = jnp.sum(xw * x, axis=0, keepdims=True)
    stats_ref[...] += jnp.concatenate([s1, s2], axis=0)


# ---------------------------------------------------------------------------
# Kernel 4: BN normalize -> ReLU -> segment-sum pooling (row-tiled accumulate).
#   stats_ref: (2, H)      f32   (grid-invariant)
#   gb_ref   : (2, H)      f32   gamma / beta (grid-invariant)
#   x_ref    : (te, H)     bf16
#   p_ref    : (G, te)     bf16  0/1 pooling tile
#   out_ref  : (G, H)      f32   accumulator
# ---------------------------------------------------------------------------
def bn_pool_kernel(stats_ref, gb_ref, x_ref, p_ref, out_ref):
    @pl.when(pl.program_id(0) == 0)
    def _():
        out_ref[...] = jnp.zeros_like(out_ref)

    mean = stats_ref[0:1, :]
    var = jnp.maximum(stats_ref[1:2, :] - mean * mean, 0.0)   # biased variance
    scale = gb_ref[0:1, :] * jax.lax.rsqrt(var + 1e-5)
    shift = gb_ref[1:2, :] - mean * scale
    y = jnp.maximum(x_ref[...].astype(jnp.float32) * scale + shift, 0.0)
    out_ref[...] += jnp.dot(p_ref[...], y.astype(jnp.bfloat16),
                            preferred_element_type=jnp.float32)


# ---------------------------------------------------------------------------
# Wrapper
# ---------------------------------------------------------------------------
def sage_forward(x, edge_index, ptr, params):
    """x: (N, F) f32; edge_index: (2, E) int32 [src; dst]; ptr: (G+1,) int32."""
    n_nodes, n_feat = x.shape
    n_graphs = ptr.shape[0] - 1
    n_hidden = params["layers"][0][0].shape[1]
    vmem_limit = _vmem_limit_bytes()

    LANE = 128
    f_pad = _round_up(n_feat, LANE)
    h_pad = _round_up(n_hidden, LANE)
    if n_nodes <= 256:
        n_pad = _round_up(n_nodes, LANE)   # 128 or 256
        tm = 128
        tk = n_pad                         # single K step
    else:
        tm, tk = 256, 512
        n_pad = _round_up(n_nodes, 512)    # divisible by both tm and tk
    g_pad = _round_up(n_graphs, 16)

    # --- dense 0/1 adjacency (exact in bf16) + f32 reciprocal in-degree.
    # TODO(synk): CSR + scalar-prefetch gather aggregation for O(E) traffic.
    src, dst = edge_index[0], edge_index[1]
    adj = jnp.zeros((n_nodes, n_nodes), jnp.float32).at[dst, src].add(1.0)
    deg = jnp.sum(adj, axis=1, keepdims=True)
    inv_deg = 1.0 / jnp.maximum(deg, 1.0)
    adj_p = jnp.pad(adj, ((0, n_pad - n_nodes), (0, n_pad - n_nodes))).astype(jnp.bfloat16)
    inv_p = jnp.pad(inv_deg, ((0, n_pad - n_nodes), (0, 0))).astype(jnp.float32)

    # --- segment_csr pooling matrix (0/1, exact in bf16); padded cols/rows are zero
    node_ids = jnp.arange(n_nodes)[None, :]
    pool = ((node_ids >= ptr[:-1, None]) & (node_ids < ptr[1:, None])).astype(jnp.float32)
    pool = jnp.pad(pool, ((0, g_pad - n_graphs), (0, n_pad - n_nodes))).astype(jnp.bfloat16)

    # --- padded bf16 activations
    xp = jnp.pad(x, ((0, n_pad - n_nodes), (0, f_pad - n_feat))).astype(jnp.bfloat16)

    # --- horizontally stacked, padded weights [W_l | W_r] and biases [0 | b]
    in_pads = [f_pad] + [h_pad] * 4
    w_st, b_st = [], []
    for li, (wl, wr, b) in enumerate(params["layers"]):
        fin = wl.shape[0]
        in_p = in_pads[li]
        wlp = jnp.pad(wl, ((0, in_p - fin), (0, h_pad - n_hidden)))
        wrp = jnp.pad(wr, ((0, in_p - fin), (0, h_pad - n_hidden)))
        w_st.append(jnp.concatenate([wlp, wrp], axis=1).astype(jnp.bfloat16))
        bp = jnp.pad(b, (0, h_pad - n_hidden))
        b_st.append(jnp.concatenate([jnp.zeros_like(bp), bp])[None, :].astype(jnp.float32))

    gb = jnp.stack([jnp.pad(params["gamma"], (0, h_pad - n_hidden)),
                    jnp.pad(params["beta"], (0, h_pad - n_hidden))],
                   axis=0).astype(jnp.float32)

    # row-validity mask pre-scaled by 1/n_nodes (single-pass BN statistics)
    msk = ((jnp.arange(n_pad) < n_nodes).astype(jnp.float32)[:, None]
           / jnp.float32(n_nodes))

    # --- 5 SAGEConv layers: transform (X @ [W_l|W_r] + b) then K-tiled aggregation
    cur = xp
    for li in range(5):
        h2 = _transform(cur, w_st[li], b_st[li], tm, vmem_limit)
        cur = _aggregate(adj_p, h2, inv_p, h_pad, tm, tk, vmem_limit)

    # --- BN statistics pass (row-tiled reduction)
    te = tk
    stats_cost = pl.CostEstimate(
        flops=4 * n_pad * h_pad, transcendentals=0,
        bytes_accessed=cur.size * 2 + n_pad * 4 + 2 * h_pad * 4)
    stats = pl.pallas_call(
        bn_stats_kernel,
        out_shape=jax.ShapeDtypeStruct((2, h_pad), jnp.float32),
        grid_spec=pltpu.PrefetchScalarGridSpec(
            num_scalar_prefetch=0,
            grid=(n_pad // te,),
            in_specs=[pl.BlockSpec((te, h_pad), lambda i: (i, 0)),
                      pl.BlockSpec((te, 1), lambda i: (i, 0))],
            out_specs=pl.BlockSpec((2, h_pad), lambda i: (0, 0)),
        ),
        compiler_params=pltpu.CompilerParams(
            dimension_semantics=("arbitrary",),
            vmem_limit_bytes=vmem_limit,
        ),
        cost_estimate=stats_cost,
    )(cur, msk)

    # --- BN normalize -> ReLU -> pool pass (row-tiled accumulation into (G, H))
    pool_cost = pl.CostEstimate(
        flops=2 * g_pad * n_pad * h_pad + 6 * n_pad * h_pad,
        transcendentals=h_pad,
        bytes_accessed=cur.size * 2 + pool.size * 2 + g_pad * h_pad * 4)
    out = pl.pallas_call(
        bn_pool_kernel,
        out_shape=jax.ShapeDtypeStruct((g_pad, h_pad), jnp.float32),
        grid_spec=pltpu.PrefetchScalarGridSpec(
            num_scalar_prefetch=0,
            grid=(n_pad // te,),
            in_specs=[pl.BlockSpec((2, h_pad), lambda i: (0, 0)),
                      pl.BlockSpec((2, h_pad), lambda i: (0, 0)),
                      pl.BlockSpec((te, h_pad), lambda i: (i, 0)),
                      pl.BlockSpec((g_pad, te), lambda i: (0, i))],
            out_specs=pl.BlockSpec((g_pad, h_pad), lambda i: (0, 0)),
        ),
        compiler_params=pltpu.CompilerParams(
            dimension_semantics=("arbitrary",),
            vmem_limit_bytes=vmem_limit,
        ),
        cost_estimate=pool_cost,
    )(stats, gb, cur, pool)

    return out[:n_graphs, :n_hidden]


# ---------------------------------------------------------------------------
# Pure-JAX f32 reference (PyTorch-module semantics) for validation.
# ---------------------------------------------------------------------------
def sage_reference(x, edge_index, ptr, params):
    src, dst = edge_index[0], edge_index[1]
    n = x.shape[0]
    adj = jnp.zeros((n, n), jnp.float32).at[dst, src].add(1.0)
    deg = jnp.sum(adj, axis=1, keepdims=True)
    a = adj / jnp.maximum(deg, 1.0)
    h = x
    for (wl, wr, b) in params["layers"]:
        h = (a @ h) @ wl + h @ wr + b
    mean = jnp.mean(h, axis=0)
    var = jnp.mean((h - mean) ** 2, axis=0)        # biased, training-mode BN
    h = (h - mean) * jax.lax.rsqrt(var + 1e-5) * params["gamma"] + params["beta"]
    h = jnp.maximum(h, 0.0)
    n_graphs = ptr.shape[0] - 1
    seg = jnp.searchsorted(ptr[1:], jnp.arange(n), side="right")
    return jax.ops.segment_sum(h, seg, num_segments=n_graphs)


def init_params(key, n_feat, n_hidden):
    params = {"layers": []}
    dims = [n_feat] + [n_hidden] * 5
    for i in range(5):
        key, k1, k2 = jax.random.split(key, 3)
        wl = 0.1 * jax.random.normal(k1, (dims[i], n_hidden), jnp.float32)
        wr = 0.1 * jax.random.normal(k2, (dims[i], n_hidden), jnp.float32)
        b = jnp.zeros((n_hidden,), jnp.float32)
        params["layers"].append((wl, wr, b))
    params["gamma"] = jnp.ones((n_hidden,), jnp.float32)
    params["beta"] = jnp.zeros((n_hidden,), jnp.float32)
    return params


if __name__ == "__main__":
    key = jax.random.PRNGKey(0)

    n_feat, n_hidden = 8, 32
    n_graphs, nodes_per_graph = 4, 8
    n_nodes = n_graphs * nodes_per_graph

    key, kx = jax.random.split(key)
    x = jax.random.normal(kx, (n_nodes, n_feat), jnp.float32)

    # deterministic bidirectional ring edges inside each graph
    src_list, dst_list = [], []
    for g in range(n_graphs):
        base = g * nodes_per_graph
        for i in range(nodes_per_graph):
            u, v = base + i, base + (i + 1) % nodes_per_graph
            src_list += [u, v]
            dst_list += [v, u]
    edge_index = jnp.array([src_list, dst_list], dtype=jnp.int32)

    # CSR pointer array (what G2GNN passes to segment_csr)
    ptr = jnp.arange(0, n_nodes + 1, nodes_per_graph, dtype=jnp.int32)

    params = init_params(key, n_feat, n_hidden)

    out = sage_forward(x, edge_index, ptr, params)
    jax.block_until_ready(out)
    assert out.shape == (n_graphs, n_hidden)
    assert bool(jnp.all(jnp.isfinite(out)))

    # validate against the pure-JAX f32 reference (bf16 activation path -> loose tol)
    ref = sage_reference(x, edge_index, ptr, params)
    err = float(jnp.max(jnp.abs(out - ref)))
    ref_scale = float(jnp.max(jnp.abs(ref))) + 1e-6
    assert err <= 0.1 * ref_scale + 0.05, f"max abs err {err} (ref scale {ref_scale})"

    print("KERNEL_OK")
</pallas_src>

<mosaic_0001>
module attributes {stable_mosaic.version = 11 : i64} {
  func.func @transform_kernel(%arg0: i32, %arg1: memref<128x128xbf16, #tpu.memory_space<vmem>>, %arg2: memref<128x256xbf16, #tpu.memory_space<vmem>>, %arg3: memref<1x256xf32, #tpu.memory_space<vmem>>, %arg4: memref<128x256xbf16, #tpu.memory_space<vmem>>) attributes {dimension_semantics = [#tpu.dimension_semantics<parallel>], iteration_bounds = array<i64: 1>, scalar_prefetch = 0 : i64, scratch_operands = 0 : i64, tpu.core_type = #tpu.core_type<tc>, window_params = [{transform_indices = @transform_0, window_bounds = array<i64: 128, 128>}, {pipeline_mode = #tpu.pipeline_mode<synchronous>, transform_indices = @transform_1, window_bounds = array<i64: 128, 256>}, {pipeline_mode = #tpu.pipeline_mode<synchronous>, transform_indices = @transform_2, window_bounds = array<i64: 1, 256>}, {transform_indices = @transform_3, window_bounds = array<i64: 128, 256>}]} {
    %c0 = arith.constant 0 : index
    %c0_0 = arith.constant 0 : index
    %0 = vector.load %arg1[%c0, %c0_0] : memref<128x128xbf16, #tpu.memory_space<vmem>>, vector<128x128xbf16>
    %c0_1 = arith.constant 0 : index
    %c0_2 = arith.constant 0 : index
    %1 = vector.load %arg2[%c0_1, %c0_2] : memref<128x256xbf16, #tpu.memory_space<vmem>>, vector<128x256xbf16>
    %cst = arith.constant dense<0.000000e+00> : vector<128x256xf32>
    %2 = tpu.matmul %0, %1, %cst {dimension_numbers = #tpu.dot_dimension_numbers<[1], [0], [0], [1], [0, 0, 1, 1], [], []>} : vector<128x128xbf16>, vector<128x256xbf16>, vector<128x256xf32> -> vector<128x256xf32>
    %c0_3 = arith.constant 0 : index
    %c0_4 = arith.constant 0 : index
    %3 = vector.load %arg3[%c0_3, %c0_4] : memref<1x256xf32, #tpu.memory_space<vmem>>, vector<1x256xf32>
    %4 = vector.broadcast %3 : vector<1x256xf32> to vector<128x256xf32>
    %5 = arith.addf %2, %4 : vector<128x256xf32>
    %6 = arith.truncf %5 : vector<128x256xf32> to vector<128x256xbf16>
    %c0_5 = arith.constant 0 : index
    %c0_6 = arith.constant 0 : index
    %7 = vector.load %arg4[%c0_5, %c0_6] : memref<128x256xbf16, #tpu.memory_space<vmem>>, vector<128x256xbf16>
    tpu.vector_store %arg4[%c0_5, %c0_6], %6 {strides = array<i32>} : memref<128x256xbf16, #tpu.memory_space<vmem>>, vector<128x256xbf16>,
    return
  }
  func.func @transform_0(%arg0: i32) -> (i32, i32) {
    %c0_i32 = arith.constant 0 : i32
    %c0_i32_0 = arith.constant 0 : i32
    return %arg0, %c0_i32 : i32, i32
  }
  func.func @transform_1(%arg0: i32) -> (i32, i32) {
    %c0_i32 = arith.constant 0 : i32
    %c0_i32_0 = arith.constant 0 : i32
    %c0_i32_1 = arith.constant 0 : i32
    return %c0_i32, %c0_i32_0 : i32, i32
  }
  func.func @transform_2(%arg0: i32) -> (i32, i32) {
    %c0_i32 = arith.constant 0 : i32
    %c0_i32_0 = arith.constant 0 : i32
    %c0_i32_1 = arith.constant 0 : i32
    return %c0_i32, %c0_i32_0 : i32, i32
  }
  func.func @transform_3(%arg0: i32) -> (i32, i32) {
    %c0_i32 = arith.constant 0 : i32
    %c0_i32_0 = arith.constant 0 : i32
    return %arg0, %c0_i32 : i32, i32
  }
}

</mosaic_0001>

<bundles_post_ra>
// kernel: tpu_custom_call.1
= control target key start
LH: loop header
LB: loop body
LE: loop exit
PB: predicated region body
PF: predicated region fallthrough
CT: control target
= control target key end

     0   :  { %8 = vsyncpa [#allocation3], 0  ;;  %s727_s0 = inlined_call_operand.hbm [shape: bf16[128,128], index: 0, kind: input, shape index: {}]   ;;  %s728_s1 = inlined_call_operand.hbm [shape: bf16[128,256], index: 1, kind: input, shape index: {}]   ;;  %s729_s2 = inlined_call_operand.vmem [shape: f32[1,256], index: 2, kind: input, shape index: {}]   ;;  %s730_s3 = inlined_call_operand.hbm [shape: bf16[128,256], index: 3, kind: output, shape index: {}]  }
   0x1   :  { %9 = vsyncpa [#allocation6], 0 }
   0x2   :  { %10 = vsyncpa [#allocation4], 0  ;;  %s637_s12 = smov [#allocation2]  }
   0x3   :  { %s16_s13 = sshll.u32 %s637_s12, 4  ;;  %s17_s13 = int_to_ptr.vmem [resolvable:$true] %s16_s13 }
   0x4   :  { %s579_s14 = scalar_lea.vmem %s17_s13, 1024  ;;  %p584_p1 = scmp.lt.s32.totalorder %s17_s13, %s17_s13 }
   0x5   :  { %p580_p0 = scmp.ne.s32.totalorder %s17_s13, %s579_s14  ;;  %p585_p2 = scmp.lt.s32.totalorder %s579_s14, %s579_s14 }
   0x7   :  { %p586_p3 = por %p585_p2, %p584_p1 }
   0x9   :  { %p587_p4 = pnand %p586_p3, %p580_p0 }
   0xb   :  { %590 = shalt.err (!%p587_p4)
}
   0xc   :  { %s638_s15 = smov 64   ;;  %s639_s16 = smov 4  }
   0xd   :  { %22 = dma.hbm_to_vmem [thread:$0]  %s727_s0, 1024, %s17_s13, [#allocation3], %s638_s15, %s638_s15, %s639_s16  }
   0xe   :  { %s640_s19 = smov [#allocation5]  }
   0xf   :  { %s28_s20 = sshll.u32 %s640_s19, 4  ;;  %s29_s20 = int_to_ptr.vmem [resolvable:$true] %s28_s20 }
  0x10   :  { %s599_s21 = scalar_lea.vmem %s29_s20, 2048  ;;  %p604_p6 = scmp.lt.s32.totalorder %s29_s20, %s29_s20 }
  0x11   :  { %p600_p5 = scmp.ne.s32.totalorder %s29_s20, %s599_s21  ;;  %p605_p7 = scmp.lt.s32.totalorder %s599_s21, %s599_s21 }
  0x13   :  { %p606_p8 = por %p605_p7, %p604_p6 }
  0x15   :  { %p607_p9 = pnand %p606_p8, %p600_p5 }
  0x17   :  { %610 = shalt.err (!%p607_p9)
}
  0x18   :  { %s641_s22 = smov 128   ;;  %s642_s23 = smov 8  }
  0x19   :  { %34 = dma.hbm_to_vmem [thread:$0]  %s728_s1, 2048, %s29_s20, [#allocation6], %s641_s22, %s641_s22, %s642_s23  }
  0x1a   :  { %631 = dma.done.wait [#allocation3], 1024  }
  0x1b   :  { %632 = vsyncadd [#allocation3], 4294966272 }
  0x1c   :  { %633 = dma.done.wait [#allocation6], 2048  }
  0x1d   :  { %634 = vsyncadd [#allocation6], 4294965248  ;;  %v643_v0 = vmov 0   ;;  %v539_v1 = vld [vmem:[#allocation5 + $0x74] ss:$8 sps:$4 sm:$0xff]   ;;  %v563_v17 = vld [vmem:[#allocation2] sm:$0xff]   ;;  %v78_v25 = vlaneseq }
  0x1e   :  { %248 = vmatprep.mubr.bf16.mxu0 %v643_v0  ;;  %288 = vmatprep.mubr.bf16.mxu1 %v643_v0  ;;  %v541_v2 = vld [vmem:[#allocation5 + $0x70] ss:$8 sps:$4 sm:$0xff]   ;;  %v542_v3 = vld [vmem:[#allocation5 + $0x64] ss:$8 sps:$4 sm:$0xff]   ;;  %v544_v4 = vld [vmem:[#allocation5 + $0x60] ss:$8 sps:$4 sm:$0xff]  }
  0x1f   :  { %216 = vmatprep.subr.bf16.mxu0 %v539_v1  ;;  %515 = vmatprep.subr.bf16.mxu1 %v539_v1  ;;  %v545_v5 = vld [vmem:[#allocation5 + $0x54] ss:$8 sps:$4 sm:$0xff]   ;;  %v547_v6 = vld [vmem:[#allocation5 + $0x50] ss:$8 sps:$4 sm:$0xff]   ;;  %v548_v7 = vld [vmem:[#allocation5 + $0x44] ss:$8 sps:$4 sm:$0xff]  }
  0x20   :  { %217 = vmatpush1.bf16.msra.mxu0 %v541_v2  ;;  %523 = vmatpush1.bf16.msra.mxu1 %v541_v2  ;;  %v550_v8 = vld [vmem:[#allocation5 + $0x40] ss:$8 sps:$4 sm:$0xff]   ;;  %v551_v9 = vld [vmem:[#allocation5 + $0x34] ss:$8 sps:$4 sm:$0xff]   ;;  %v553_v10 = vld [vmem:[#allocation5 + $0x30] ss:$8 sps:$4 sm:$0xff]  }
  0x21   :  { %218 = vmatprep.subr.bf16.mxu0 %v542_v3  ;;  %516 = vmatprep.subr.bf16.mxu1 %v542_v3  ;;  %v554_v11 = vld [vmem:[#allocation5 + $0x24] ss:$8 sps:$4 sm:$0xff]   ;;  %v556_v12 = vld [vmem:[#allocation5 + $0x20] ss:$8 sps:$4 sm:$0xff]   ;;  %v557_v13 = vld [vmem:[#allocation5 + $0x14] ss:$8 sps:$4 sm:$0xff]  }
  0x22   :  { %v559_v14 = vld [vmem:[#allocation5 + $0x10] ss:$8 sps:$4 sm:$0xff]   ;;  %v560_v15 = vld [vmem:[#allocation5 + $0x4] ss:$8 sps:$4 sm:$0xff]   ;;  %v562_v16 = vld [vmem:[#allocation5] ss:$8 sps:$4 sm:$0xff]  }
  0x23   :  { %v564_v18 = vld [vmem:[#allocation2 + $0x20] sm:$0xff]   ;;  %v565_v19 = vld [vmem:[#allocation2 + $0x8] sm:$0xff]   ;;  %v567_v21 = vld [vmem:[#allocation2 + $0x10] sm:$0xff]   ;;  %v79_v26 = vshrl.u32 %v78_v25, 7 }
  0x24   :  { %219 = vmatpush1.bf16.msra.mxu0 %v544_v4  ;;  %524 = vmatpush1.bf16.msra.mxu1 %v544_v4  ;;  %v566_v20 = vld [vmem:[#allocation2 + $0x28] sm:$0xff]   ;;  %v568_v22 = vld [vmem:[#allocation2 + $0x30] sm:$0xff]   ;;  %v569_v23 = vld [vmem:[#allocation2 + $0x18] sm:$0xff]  }
  0x25   :  { %220 = vmatprep.subr.bf16.mxu0 %v545_v5  ;;  %517 = vmatprep.subr.bf16.mxu1 %v545_v5  ;;  %v570_v24 = vld [vmem:[#allocation2 + $0x38] sm:$0xff]   ;;  %v80_v27 = vsub.s32 0, %v79_v26  ;;  %v84_v28 = vsub.s32 1, %v79_v26  ;;  %v76_v29 = vld [vmem:[%s729_s2] sm:$0x3]  ;;  %s644_s2 = smov [#allocation7]  }
  0x26   :  { %s446_s26 = sshll.u32 %s644_s2, 4  ;;  %s447_s26 = int_to_ptr.vmem [resolvable:$true] %s446_s26 }
  0x27   :  { %v685_v30 = vrot.slane %v76_v29, %v80_v27  ;;  %v687_v31 = vrot.slane %v76_v29, %v84_v28  ;;  %s611_s27 = scalar_lea.vmem %s447_s26, 2048  ;;  %p616_p11 = scmp.lt.s32.totalorder %s447_s26, %s447_s26 }
  0x28   :  { %221 = vmatpush1.bf16.msra.mxu0 %v547_v6  ;;  %525 = vmatpush1.bf16.msra.mxu1 %v547_v6  ;;  %p612_p10 = scmp.ne.s32.totalorder %s447_s26, %s611_s27  ;;  %p617_p12 = scmp.lt.s32.totalorder %s611_s27, %s611_s27 }
  0x29   :  { %222 = vmatprep.subr.bf16.mxu0 %v548_v7  ;;  %518 = vmatprep.subr.bf16.mxu1 %v548_v7 }
  0x2a   :  { %p618_p13 = por %p617_p12, %p616_p11 }
  0x2c   :  { %223 = vmatpush1.bf16.msra.mxu0 %v550_v8  ;;  %526 = vmatpush1.bf16.msra.mxu1 %v550_v8  ;;  %p619_p0 = pnand %p618_p13, %p612_p10 }
  0x2d   :  { %224 = vmatprep.subr.bf16.mxu0 %v551_v9  ;;  %519 = vmatprep.subr.bf16.mxu1 %v551_v9 }
  0x30   :  { %225 = vmatpush1.bf16.msra.mxu0 %v553_v10  ;;  %527 = vmatpush1.bf16.msra.mxu1 %v553_v10 }
  0x31   :  { %226 = vmatprep.subr.bf16.mxu0 %v554_v11  ;;  %520 = vmatprep.subr.bf16.mxu1 %v554_v11 }
  0x34   :  { %227 = vmatpush1.bf16.msra.mxu0 %v556_v12  ;;  %528 = vmatpush1.bf16.msra.mxu1 %v556_v12 }
  0x35   :  { %228 = vmatprep.subr.bf16.mxu0 %v557_v13  ;;  %521 = vmatprep.subr.bf16.mxu1 %v557_v13 }
  0x38   :  { %229 = vmatpush1.bf16.msra.mxu0 %v559_v14  ;;  %529 = vmatpush1.bf16.msra.mxu1 %v559_v14 }
  0x39   :  { %230 = vmatprep.subr.bf16.mxu0 %v560_v15  ;;  %522 = vmatprep.subr.bf16.mxu1 %v560_v15 }
  0x3c   :  { %231 = vmatpush1.bf16.msra.mxu0 %v562_v16  ;;  %530 = vmatpush1.bf16.msra.mxu1 %v562_v16 }
  0x3f   :  { %249 = vmatmul.mubr.bf16.vlgmr.msra.gmra.mxu0 %v563_v17  ;;  %289 = vmatmul.mubr.bf16.vlgmr.msra.gmra.mxu1 %v564_v18 }
  0x40   :  { %258 = vmatprep.mubr.bf16.mxu0 %v643_v0  ;;  %298 = vmatprep.mubr.bf16.mxu1 %v643_v0 }
  0x47   :  { %259 = vmatmul.mubr.bf16.gmra.mxu0 %v565_v19  ;;  %299 = vmatmul.mubr.bf16.gmra.mxu1 %v566_v20 }
  0x48   :  { %268 = vmatprep.mubr.bf16.mxu0 %v643_v0  ;;  %308 = vmatprep.mubr.bf16.mxu1 %v643_v0 }
  0x4f   :  { %269 = vmatmul.mubr.bf16.gmra.mxu0 %v567_v21  ;;  %309 = vmatmul.mubr.bf16.gmra.mxu1 %v568_v22 }
  0x50   :  { %278 = vmatprep.mubr.bf16.mxu0 %v643_v0  ;;  %318 = vmatprep.mubr.bf16.mxu1 %v643_v0 }
  0x57   :  { %279 = vmatmul.mubr.bf16.gmra.mxu0 %v569_v23  ;;  %319 = vmatmul.mubr.bf16.gmra.mxu1 %v570_v24 }
  0xff   :  { %v250_v32 = vpop.f32.mrf.mxu0  ;;  %v290_v33 = vpop.f32.mrf.mxu1 }
 0x100   :  { %v251_v36 = vadd.f32 %v250_v32, %v685_v30  ;;  %v291_v37 = vadd.f32 %v290_v33, %v685_v30 }
 0x101   :  { %v252_v34 = vpop.f32.mrf.mxu0  ;;  %v292_v35 = vpop.f32.mrf.mxu1 }
 0x102   :  { %v253_v38 = vadd.f32 %v252_v34, %v687_v31  ;;  %v293_v39 = vadd.f32 %v292_v35, %v687_v31 }
 0x103   :  { %v254_v40 = vpop.f32.mrf.mxu0  ;;  %v294_v41 = vpop.f32.mrf.mxu1 }
 0x104   :  { %v499_v42 = vpack.c.bf16 %v253_v38, %v251_v36  ;;  %v507_v43 = vpack.c.bf16 %v293_v39, %v291_v37  ;;  %v255_v46 = vadd.f32 %v254_v40, %v685_v30  ;;  %v295_v47 = vadd.f32 %v294_v41, %v685_v30 }
 0x105   :  { %v256_v44 = vpop.f32.mrf.mxu0  ;;  %v296_v45 = vpop.f32.mrf.mxu1 }
 0x106   :  { %425 = vst [vmem:[#allocation7] sm:$0xff] %v499_v42  ;;  %433 = vst [vmem:[#allocation7 + $0x40] sm:$0xff] %v507_v43  ;;  %v257_v48 = vadd.f32 %v256_v44, %v687_v31  ;;  %v297_v49 = vadd.f32 %v296_v45, %v687_v31 }
 0x107   :  { %v260_v50 = vpop.f32.mrf.mxu0  ;;  %v300_v51 = vpop.f32.mrf.mxu1 }
 0x108   :  { %v500_v52 = vpack.c.bf16 %v257_v48, %v255_v46  ;;  %v508_v53 = vpack.c.bf16 %v297_v49, %v295_v47  ;;  %v261_v56 = vadd.f32 %v260_v50, %v685_v30  ;;  %v301_v57 = vadd.f32 %v300_v51, %v685_v30 }
 0x109   :  { %v262_v54 = vpop.f32.mrf.mxu0  ;;  %v302_v55 = vpop.f32.mrf.mxu1 }
 0x10a   :  { %426 = vst [vmem:[#allocation7 + $0x8] sm:$0xff] %v500_v52  ;;  %434 = vst [vmem:[#allocation7 + $0x48] sm:$0xff] %v508_v53  ;;  %v263_v58 = vadd.f32 %v262_v54, %v687_v31  ;;  %v303_v59 = vadd.f32 %v302_v55, %v687_v31 }
 0x10b   :  { %v264_v60 = vpop.f32.mrf.mxu0  ;;  %v304_v61 = vpop.f32.mrf.mxu1 }
 0x10c   :  { %v501_v62 = vpack.c.bf16 %v263_v58, %v261_v56  ;;  %v509_v63 = vpack.c.bf16 %v303_v59, %v301_v57  ;;  %v265_v2 = vadd.f32 %v264_v60, %v685_v30  ;;  %v305_v3 = vadd.f32 %v304_v61, %v685_v30 }
 0x10d   :  { %v266_v0 = vpop.f32.mrf.mxu0  ;;  %v306_v1 = vpop.f32.mrf.mxu1 }
 0x10e   :  { %427 = vst [vmem:[#allocation7 + $0x10] sm:$0xff] %v501_v62  ;;  %435 = vst [vmem:[#allocation7 + $0x50] sm:$0xff] %v509_v63  ;;  %v267_v4 = vadd.f32 %v266_v0, %v687_v31  ;;  %v307_v5 = vadd.f32 %v306_v1, %v687_v31 }
 0x10f   :  { %v270_v6 = vpop.f32.mrf.mxu0  ;;  %v310_v7 = vpop.f32.mrf.mxu1 }
 0x110   :  { %v502_v8 = vpack.c.bf16 %v267_v4, %v265_v2  ;;  %v510_v9 = vpack.c.bf16 %v307_v5, %v305_v3  ;;  %v271_v12 = vadd.f32 %v270_v6, %v685_v30  ;;  %v311_v13 = vadd.f32 %v310_v7, %v685_v30 }
 0x111   :  { %v272_v10 = vpop.f32.mrf.mxu0  ;;  %v312_v11 = vpop.f32.mrf.mxu1 }
 0x112   :  { %428 = vst [vmem:[#allocation7 + $0x18] sm:$0xff] %v502_v8  ;;  %436 = vst [vmem:[#allocation7 + $0x58] sm:$0xff] %v510_v9  ;;  %v273_v14 = vadd.f32 %v272_v10, %v687_v31  ;;  %v313_v15 = vadd.f32 %v312_v11, %v687_v31 }
 0x113   :  { %v274_v16 = vpop.f32.mrf.mxu0  ;;  %v314_v17 = vpop.f32.mrf.mxu1 }
 0x114   :  { %v503_v18 = vpack.c.bf16 %v273_v14, %v271_v12  ;;  %v511_v19 = vpack.c.bf16 %v313_v15, %v311_v13  ;;  %v275_v22 = vadd.f32 %v274_v16, %v685_v30  ;;  %v315_v23 = vadd.f32 %v314_v17, %v685_v30 }
 0x115   :  { %v276_v20 = vpop.f32.mrf.mxu0  ;;  %v316_v21 = vpop.f32.mrf.mxu1 }
 0x116   :  { %429 = vst [vmem:[#allocation7 + $0x20] sm:$0xff] %v503_v18  ;;  %437 = vst [vmem:[#allocation7 + $0x60] sm:$0xff] %v511_v19  ;;  %v277_v24 = vadd.f32 %v276_v20, %v687_v31  ;;  %v317_v25 = vadd.f32 %v316_v21, %v687_v31 }
 0x117   :  { %v280_v26 = vpop.f32.mrf.mxu0  ;;  %v320_v27 = vpop.f32.mrf.mxu1 }
 0x118   :  { %v504_v28 = vpack.c.bf16 %v277_v24, %v275_v22  ;;  %v512_v29 = vpack.c.bf16 %v317_v25, %v315_v23  ;;  %v281_v34 = vadd.f32 %v280_v26, %v685_v30  ;;  %v321_v35 = vadd.f32 %v320_v27, %v685_v30 }
 0x119   :  { %v282_v32 = vpop.f32.mrf.mxu0  ;;  %v322_v33 = vpop.f32.mrf.mxu1 }
 0x11a   :  { %430 = vst [vmem:[#allocation7 + $0x28] sm:$0xff] %v504_v28  ;;  %438 = vst [vmem:[#allocation7 + $0x68] sm:$0xff] %v512_v29  ;;  %v283_v36 = vadd.f32 %v282_v32, %v687_v31  ;;  %v323_v37 = vadd.f32 %v322_v33, %v687_v31 }
 0x11b   :  { %v284_v38 = vpop.f32.mrf.mxu0  ;;  %v324_v39 = vpop.f32.mrf.mxu1 }
 0x11c   :  { %v505_v40 = vpack.c.bf16 %v283_v36, %v281_v34  ;;  %v513_v41 = vpack.c.bf16 %v323_v37, %v321_v35  ;;  %v285_v44 = vadd.f32 %v284_v38, %v685_v30  ;;  %v325_v45 = vadd.f32 %v324_v39, %v685_v30 }
 0x11d   :  { %v286_v42 = vpop.f32.mrf.mxu0  ;;  %v326_v43 = vpop.f32.mrf.mxu1 }
 0x11e   :  { %431 = vst [vmem:[#allocation7 + $0x30] sm:$0xff] %v505_v40  ;;  %439 = vst [vmem:[#allocation7 + $0x70] sm:$0xff] %v513_v41  ;;  %v287_v46 = vadd.f32 %v286_v42, %v687_v31  ;;  %v327_v47 = vadd.f32 %v326_v43, %v687_v31 }
 0x120   :  { %v506_v48 = vpack.c.bf16 %v287_v46, %v285_v44  ;;  %v514_v49 = vpack.c.bf16 %v327_v47, %v325_v45 }
 0x122   :  { %432 = vst [vmem:[#allocation7 + $0x38] sm:$0xff] %v506_v48  ;;  %440 = vst [vmem:[#allocation7 + $0x78] sm:$0xff] %v514_v49 }
 0x123   :  { %622 = shalt.err (!%p619_p0)
}
 0x124   :  { %452 = dma.vmem_to_hbm [thread:$0]  %s447_s26, 2048, %s730_s3, [#allocation4], %s641_s22, %s641_s22, %s642_s23  }
 0x125   :  { %635 = dma.done.wait [#allocation4], 2048  }
 0x126   :  { %636 = vsyncadd [#allocation4], 4294965248 }
 0x127   :  { %456 = vsyncpa [#allocation3], 1 }
 0x128   :  { %457 = vsyncpa [#allocation6], 1 }
 0x129   :  { %458 = vsyncpa [#allocation4], 1 }

</bundles_post_ra>
